<compile_context>
chip_gen: v6e
topology: v6e:2x2x1
jax: 0.10.0
libtpu: 0.0.40
codegen_flags: <defaults>
</compile_context>

<pallas_src>
import functools

import numpy as np
import jax
import jax.numpy as jnp
from jax.experimental import pallas as pl
from jax.experimental.pallas import tpu as pltpu

NUM_KEYPOINTS = 17            # COCO keypoints produced by the pose net
HEAD_GROUP = (0, 1, 2, 3, 4)  # head keypoints merged (group_mode='sum')
NUM_GROUPED = NUM_KEYPOINTS - len(HEAD_GROUP) + 1  # 13 output scoremap channels
STRIDE = 4                    # pose-net output stride (HRNet emits H/4 x W/4 heatmaps)
_LANES = 128
_NEG_BIG = -1e30


def _grouping_matrix():
    """Constant (17, 13) matrix implementing HeatmapProcessor2 group_mode='sum'."""
    g = np.zeros((NUM_KEYPOINTS, NUM_GROUPED), np.float32)
    g[list(HEAD_GROUP), 0] = 1.0
    for j in range(NUM_KEYPOINTS - len(HEAD_GROUP)):
        g[len(HEAD_GROUP) + j, 1 + j] = 1.0
    return g


# ---------------------------------------------------------------------------
# Fused kernel: conv-as-matmul + grouping/scale (pre-folded) + softmax + conf + argmax
# ---------------------------------------------------------------------------
def _scoremap_kernel(p_ref, w_ref, sm_ref, ci_ref, *, hw_valid):
    # p_ref : (Bt, K, HWp)  bf16 im2col patches (K = C*4*4, HWp = pad128(Ho*Wo))
    # w_ref : (13, K)       bf16 grouped conv weight with norm_scale folded in
    # sm_ref: (Bt, 13, HWp) spatial-softmax scoremap
    # ci_ref: (Bt, 13, 2)   f32: lane 0 = confidence, lane 1 = flat argmax (as f32)
    bt, _, hw_pad = p_ref.shape
    w = w_ref[...]                                                    # resident (13, K)

    # Hoisted loop invariants (JAX does not CSE broadcast_in_dim).
    iota = jax.lax.broadcasted_iota(jnp.int32, (NUM_GROUPED, hw_pad), 1)
    two = jax.lax.broadcasted_iota(jnp.int32, (NUM_GROUPED, 2), 1)
    mask_lanes = hw_pad != hw_valid
    if mask_lanes:
        lane_ok = iota < hw_valid

    for b in range(bt):   # small static unroll; per-image tiles are a few vregs
        # MXU matmul straight into channels-on-sublanes / HW-on-lanes layout.
        hm = jnp.dot(w, p_ref[b], preferred_element_type=jnp.float32)  # (13, HWp) f32
        if mask_lanes:
            hm = jnp.where(lane_ok, hm, _NEG_BIG)                      # kill padded lanes

        # Spatial softmax (normalize_heatmap=True); lane-axis reductions, f32 math.
        mx = jnp.max(hm, axis=-1, keepdims=True)                       # (13, 1)
        e = jnp.exp(hm - mx)
        denom = jnp.sum(e, axis=-1, keepdims=True)                     # (13, 1)
        inv = pl.reciprocal(denom, approx=True)                        # EUP, wide mul only
        sm_ref[b] = (e * inv).astype(sm_ref.dtype)

        # confidence = max(softmax) = 1/denom : exact divide on a (13,1) column.
        conf = 1.0 / denom
        # Flat argmax (first occurrence) on pre-softmax logits (softmax is monotone).
        cand = jnp.where(hm >= mx, iota, hw_pad)
        idx = jnp.min(cand, axis=-1, keepdims=True)                    # (13, 1) int32
        ci_ref[b] = jnp.where(two == 0, conf, idx.astype(jnp.float32))  # (13, 2)


# ---------------------------------------------------------------------------
# ScoremapComputer forward
# ---------------------------------------------------------------------------
def scoremap_computer_forward(x, weight, bias, norm_scale, *, scoremap_dtype=jnp.float32):
    """x: (N, C, H, W) f32.  weight: (17, C*4*4) f32 in PyTorch (Cout, Cin, kh, kw)
    flatten order.  bias: (17,) f32 -- accepted for interface parity only; a
    per-channel constant is exactly a no-op for the softmax scoremap, the
    confidence (= max of softmax) and the argmax location, so it is dropped.

    # TODO(synk): the original module instantiates a full HRNet (get_pose_net) and
    # loads a checkpoint; it is replaced by a single stride-4 4x4 conv stand-in with
    # the same output contract (N, 17, H/4, W/4) feeding the same heatmap processor.
    """
    del bias
    n, c, h, w = x.shape
    ho, wo = h // STRIDE, w // STRIDE
    hw = ho * wo
    hw_pad = max(_LANES, ((hw + _LANES - 1) // _LANES) * _LANES)
    k_in = c * STRIDE * STRIDE

    # im2col in (c, kh, kw)-major order -> (N, K, Ho*Wo); reshape+transpose+cast(+pad)
    # fuse into one XLA copy fusion, and bf16 halves that round trip's HBM bytes.
    # TODO(synk): for a real HRNet feature map, gather patches in-kernel via
    # memory_space=pl.ANY + pltpu.make_async_copy to avoid materializing p at all.
    p = x.reshape(n, c, ho, STRIDE, wo, STRIDE)
    p = jnp.transpose(p, (0, 1, 3, 5, 2, 4)).reshape(n, k_in, hw)

    # Batch tile: amortize per-step overhead, keep >= 2 grid steps (v7x dual TC),
    # and stay far below v7x's smaller scoped VMEM (conservative 8 MiB budget).
    sm_bytes = jnp.dtype(scoremap_dtype).itemsize
    per_img_vmem = 2 * (k_in * hw_pad * 2                 # p block (bf16, double-buffered)
                        + NUM_GROUPED * hw_pad * sm_bytes  # sm block (double-buffered)
                        + NUM_GROUPED * 2 * 4)             # conf/idx block
    bt = int(max(1, min(8, -(-n // 2), (8 * 1024 * 1024) // max(per_img_vmem, 1))))
    n_pad = -(-n // bt) * bt

    if n_pad > n or hw_pad > hw:
        p = jnp.pad(p, ((0, n_pad - n), (0, 0), (0, hw_pad - hw)))
    p = p.astype(jnp.bfloat16)

    # Fold the 17->13 head-group sum AND norm_scale into the conv weight (exact, linear).
    g = jnp.asarray(_grouping_matrix())                               # (17, 13)
    w_g = ((g.T @ weight.astype(jnp.float32)) * norm_scale).astype(jnp.bfloat16)  # (13, K)

    kernel = functools.partial(_scoremap_kernel, hw_valid=hw)
    sm, ci = pl.pallas_call(
        kernel,
        out_shape=(
            jax.ShapeDtypeStruct((n_pad, NUM_GROUPED, hw_pad), scoremap_dtype),
            jax.ShapeDtypeStruct((n_pad, NUM_GROUPED, 2), jnp.float32),
        ),
        grid=(n_pad // bt,),
        in_specs=[
            pl.BlockSpec((bt, k_in, hw_pad), lambda i: (i, 0, 0)),
            pl.BlockSpec((NUM_GROUPED, k_in), lambda i: (0, 0)),      # resident weight
        ],
        out_specs=(
            pl.BlockSpec((bt, NUM_GROUPED, hw_pad), lambda i: (i, 0, 0)),
            pl.BlockSpec((bt, NUM_GROUPED, 2), lambda i: (i, 0, 0)),
        ),
        compiler_params=pltpu.CompilerParams(dimension_semantics=("parallel",)),
    )(p, w_g)

    scoremap = sm[:n, :, :hw].reshape(n, NUM_GROUPED, ho, wo)         # (N, 13, Ho, Wo)
    keypoints_confidence = ci[:n, :, 0]                               # (N, 13)
    flat = ci[:n, :, 1].astype(jnp.int32)                             # (N, 13)
    y = flat // wo
    xk = flat - y * wo
    keypoints_location = jnp.stack([xk, y], axis=-1)                  # (N, 13, 2) = (x, y)

    # .detach() in the reference is a no-op here (no autodiff graph attached).
    return scoremap, keypoints_confidence, keypoints_location


if __name__ == "__main__":
    key = jax.random.PRNGKey(0)
    k_x, k_w, k_b = jax.random.split(key, 3)

    # Small pose-net-like input: N=8, C=3, H=64, W=48 -> heatmaps (8, 17, 16, 12).
    # Ho*Wo = 192 exercises the lane-padding path; N=8 exercises Bt>1 batching
    # with 2 parallel grid steps.
    N, C, H, W = 8, 3, 64, 48
    x = jax.random.normal(k_x, (N, C, H, W), dtype=jnp.float32)

    # Deterministic synthetic "pose net" final-conv params (4x4, stride 4, C->17),
    # in PyTorch (Cout, Cin*kh*kw) flatten order.
    K_in = C * STRIDE * STRIDE
    weight = jax.random.normal(k_w, (NUM_KEYPOINTS, K_in), dtype=jnp.float32) * 0.1
    bias = jax.random.normal(k_b, (NUM_KEYPOINTS,), dtype=jnp.float32) * 0.01
    norm_scale = 10.0

    fwd = jax.jit(scoremap_computer_forward, static_argnames=("scoremap_dtype",))
    scoremap, conf, loc = fwd(x, weight, bias, norm_scale)
    jax.block_until_ready((scoremap, conf, loc))

    Ho, Wo = H // STRIDE, W // STRIDE
    assert scoremap.shape == (N, NUM_GROUPED, Ho, Wo)
    assert conf.shape == (N, NUM_GROUPED)
    assert loc.shape == (N, NUM_GROUPED, 2)

    # Pure-JAX reference with the same bf16 quantization as the kernel inputs.
    g = jnp.asarray(_grouping_matrix())
    w_ref = ((g.T @ weight) * norm_scale).astype(jnp.bfloat16).astype(jnp.float32)
    p_ref = x.reshape(N, C, Ho, STRIDE, Wo, STRIDE)
    p_ref = jnp.transpose(p_ref, (0, 1, 3, 5, 2, 4)).reshape(N, K_in, Ho * Wo)
    p_ref = p_ref.astype(jnp.bfloat16).astype(jnp.float32)
    logits = jnp.einsum("ck,nkl->ncl", w_ref, p_ref)                  # (N, 13, HW)
    sm_expected = jax.nn.softmax(logits, axis=-1)
    conf_expected = sm_expected.max(axis=-1)

    sm_flat = np.asarray(scoremap.reshape(N, NUM_GROUPED, Ho * Wo), dtype=np.float32)
    assert np.allclose(sm_flat, np.asarray(sm_expected), atol=5e-3)
    assert np.allclose(np.asarray(conf), np.asarray(conf_expected), atol=5e-3)
    # Scoremap value at the predicted keypoint equals the per-channel max,
    # and locations are in range.
    loc_np = np.asarray(loc)
    flat_idx = loc_np[..., 1] * Wo + loc_np[..., 0]
    picked = np.take_along_axis(sm_flat, flat_idx[..., None], axis=-1)[..., 0]
    assert np.allclose(picked, sm_flat.max(-1), atol=1e-6)
    assert np.all((loc_np[..., 0] >= 0) & (loc_np[..., 0] < Wo))
    assert np.all((loc_np[..., 1] >= 0) & (loc_np[..., 1] < Ho))

    print("KERNEL_OK")
</pallas_src>

<mosaic_0001>
module attributes {stable_mosaic.version = 11 : i64} {
  func.func @_scoremap_kernel(%arg0: i32, %arg1: memref<4x48x256xbf16, #tpu.memory_space<vmem>>, %arg2: memref<13x48xbf16, #tpu.memory_space<vmem>>, %arg3: memref<4x13x256xf32, #tpu.memory_space<vmem>>, %arg4: memref<4x13x2xf32, #tpu.memory_space<vmem>>) attributes {dimension_semantics = [#tpu.dimension_semantics<parallel>], iteration_bounds = array<i64: 2>, scalar_prefetch = 0 : i64, scratch_operands = 0 : i64, tpu.core_type = #tpu.core_type<tc>, window_params = [{transform_indices = @transform_0, window_bounds = array<i64: 4, 48, 256>}, {pipeline_mode = #tpu.pipeline_mode<synchronous>, transform_indices = @transform_1, window_bounds = array<i64: 13, 48>}, {transform_indices = @transform_2, window_bounds = array<i64: 4, 13, 256>}, {transform_indices = @transform_3, window_bounds = array<i64: 4, 13, 2>}]} {
    %c0 = arith.constant 0 : index
    %c0_0 = arith.constant 0 : index
    %0 = vector.load %arg2[%c0, %c0_0] : memref<13x48xbf16, #tpu.memory_space<vmem>>, vector<13x48xbf16>
    %1 = tpu.iota {dimensions = array<i32: 1>} : vector<13x256xi32>
    %2 = tpu.iota {dimensions = array<i32: 1>} : vector<13x2xi32>
    %c192_i32 = arith.constant 192 : i32
    %3 = vector.broadcast %c192_i32 : i32 to vector<13x256xi32>
    %4 = arith.cmpi slt, %1, %3 : vector<13x256xi32>
    %c0_1 = arith.constant 0 : index
    %c0_2 = arith.constant 0 : index
    %c0_3 = arith.constant 0 : index
    %5 = vector.load %arg1[%c0_1, %c0_2, %c0_3] : memref<4x48x256xbf16, #tpu.memory_space<vmem>>, vector<1x48x256xbf16>
    %6 = vector.shape_cast %5 : vector<1x48x256xbf16> to vector<48x256xbf16>
    %cst = arith.constant dense<0.000000e+00> : vector<13x256xf32>
    %7 = tpu.matmul %0, %6, %cst {dimension_numbers = #tpu.dot_dimension_numbers<[1], [0], [0], [1], [0, 0, 1, 1], [], []>} : vector<13x48xbf16>, vector<48x256xbf16>, vector<13x256xf32> -> vector<13x256xf32>
    %cst_4 = arith.constant -1.000000e+30 : f32
    %8 = vector.broadcast %cst_4 : f32 to vector<13x256xf32>
    %9 = arith.select %4, %7, %8 : vector<13x256xi1>, vector<13x256xf32>
    %cst_5 = arith.constant dense<0xFF800000> : vector<13xf32>
    %10 = vector.multi_reduction <maximumf>, %9, %cst_5 [1] : vector<13x256xf32> to vector<13xf32>
    %11 = vector.shape_cast %10 : vector<13xf32> to vector<13x1xf32>
    %12 = vector.broadcast %11 : vector<13x1xf32> to vector<13x256xf32>
    %13 = arith.subf %9, %12 : vector<13x256xf32>
    %14 = math.exp %13 : vector<13x256xf32>
    %cst_6 = arith.constant dense<0.000000e+00> : vector<13xf32>
    %15 = vector.multi_reduction <add>, %14, %cst_6 [1] : vector<13x256xf32> to vector<13xf32>
    %16 = vector.shape_cast %15 : vector<13xf32> to vector<13x1xf32>
    %17 = tpu.reciprocal %16 {approx = true} : vector<13x1xf32> -> vector<13x1xf32>
    %18 = vector.broadcast %17 : vector<13x1xf32> to vector<13x256xf32>
    %19 = arith.mulf %14, %18 : vector<13x256xf32>
    %c0_7 = arith.constant 0 : index
    %c0_8 = arith.constant 0 : index
    %c0_9 = arith.constant 0 : index
    %20 = vector.load %arg3[%c0_7, %c0_8, %c0_9] : memref<4x13x256xf32, #tpu.memory_space<vmem>>, vector<1x13x256xf32>
    %21 = vector.shape_cast %20 : vector<1x13x256xf32> to vector<13x256xf32>
    %22 = vector.shape_cast %19 : vector<13x256xf32> to vector<1x13x256xf32>
    tpu.vector_store %arg3[%c0_7, %c0_8, %c0_9], %22 {strides = array<i32>} : memref<4x13x256xf32, #tpu.memory_space<vmem>>, vector<1x13x256xf32>,
    %cst_10 = arith.constant 1.000000e+00 : f32
    %23 = vector.broadcast %cst_10 : f32 to vector<13x1xf32>
    %24 = arith.divf %23, %16 : vector<13x1xf32>
    %25 = vector.broadcast %11 : vector<13x1xf32> to vector<13x256xf32>
    %26 = arith.cmpf oge, %9, %25 : vector<13x256xf32>
    %c256_i32 = arith.constant 256 : i32
    %27 = vector.broadcast %c256_i32 : i32 to vector<13x256xi32>
    %28 = arith.select %26, %1, %27 : vector<13x256xi1>, vector<13x256xi32>
    %cst_11 = arith.constant dense<2147483647> : vector<13xi32>
    %29 = vector.multi_reduction <minsi>, %28, %cst_11 [1] : vector<13x256xi32> to vector<13xi32>
    %30 = vector.shape_cast %29 : vector<13xi32> to vector<13x1xi32>
    %c0_i32 = arith.constant 0 : i32
    %31 = vector.broadcast %c0_i32 : i32 to vector<13x2xi32>
    %32 = arith.cmpi eq, %2, %31 : vector<13x2xi32>
    %33 = arith.sitofp %30 : vector<13x1xi32> to vector<13x1xf32>
    %34 = vector.shape_cast %24 : vector<13x1xf32> to vector<13x1xf32>
    %35 = vector.broadcast %34 : vector<13x1xf32> to vector<13x2xf32>
    %36 = vector.shape_cast %33 : vector<13x1xf32> to vector<13x1xf32>
    %37 = vector.broadcast %36 : vector<13x1xf32> to vector<13x2xf32>
    %38 = arith.select %32, %35, %37 : vector<13x2xi1>, vector<13x2xf32>
    %c0_12 = arith.constant 0 : index
    %c0_13 = arith.constant 0 : index
    %c0_14 = arith.constant 0 : index
    %39 = vector.load %arg4[%c0_12, %c0_13, %c0_14] : memref<4x13x2xf32, #tpu.memory_space<vmem>>, vector<1x13x2xf32>
    %40 = vector.shape_cast %39 : vector<1x13x2xf32> to vector<13x2xf32>
    %41 = vector.shape_cast %38 : vector<13x2xf32> to vector<1x13x2xf32>
    tpu.vector_store %arg4[%c0_12, %c0_13, %c0_14], %41 {strides = array<i32>} : memref<4x13x2xf32, #tpu.memory_space<vmem>>, vector<1x13x2xf32>,
    %c1 = arith.constant 1 : index
    %c0_15 = arith.constant 0 : index
    %c0_16 = arith.constant 0 : index
    %42 = vector.load %arg1[%c1, %c0_15, %c0_16] : memref<4x48x256xbf16, #tpu.memory_space<vmem>>, vector<1x48x256xbf16>
    %43 = vector.shape_cast %42 : vector<1x48x256xbf16> to vector<48x256xbf16>
    %cst_17 = arith.constant dense<0.000000e+00> : vector<13x256xf32>
    %44 = tpu.matmul %0, %43, %cst_17 {dimension_numbers = #tpu.dot_dimension_numbers<[1], [0], [0], [1], [0, 0, 1, 1], [], []>} : vector<13x48xbf16>, vector<48x256xbf16>, vector<13x256xf32> -> vector<13x256xf32>
    %cst_18 = arith.constant -1.000000e+30 : f32
    %45 = vector.broadcast %cst_18 : f32 to vector<13x256xf32>
    %46 = arith.select %4, %44, %45 : vector<13x256xi1>, vector<13x256xf32>
    %cst_19 = arith.constant dense<0xFF800000> : vector<13xf32>
    %47 = vector.multi_reduction <maximumf>, %46, %cst_19 [1] : vector<13x256xf32> to vector<13xf32>
    %48 = vector.shape_cast %47 : vector<13xf32> to vector<13x1xf32>
    %49 = vector.broadcast %48 : vector<13x1xf32> to vector<13x256xf32>
    %50 = arith.subf %46, %49 : vector<13x256xf32>
    %51 = math.exp %50 : vector<13x256xf32>
    %cst_20 = arith.constant dense<0.000000e+00> : vector<13xf32>
    %52 = vector.multi_reduction <add>, %51, %cst_20 [1] : vector<13x256xf32> to vector<13xf32>
    %53 = vector.shape_cast %52 : vector<13xf32> to vector<13x1xf32>
    %54 = tpu.reciprocal %53 {approx = true} : vector<13x1xf32> -> vector<13x1xf32>
    %55 = vector.broadcast %54 : vector<13x1xf32> to vector<13x256xf32>
    %56 = arith.mulf %51, %55 : vector<13x256xf32>
    %c1_21 = arith.constant 1 : index
    %c0_22 = arith.constant 0 : index
    %c0_23 = arith.constant 0 : index
    %57 = vector.load %arg3[%c1_21, %c0_22, %c0_23] : memref<4x13x256xf32, #tpu.memory_space<vmem>>, vector<1x13x256xf32>
    %58 = vector.shape_cast %57 : vector<1x13x256xf32> to vector<13x256xf32>
    %59 = vector.shape_cast %56 : vector<13x256xf32> to vector<1x13x256xf32>
    tpu.vector_store %arg3[%c1_21, %c0_22, %c0_23], %59 {strides = array<i32>} : memref<4x13x256xf32, #tpu.memory_space<vmem>>, vector<1x13x256xf32>,
    %cst_24 = arith.constant 1.000000e+00 : f32
    %60 = vector.broadcast %cst_24 : f32 to vector<13x1xf32>
    %61 = arith.divf %60, %53 : vector<13x1xf32>
    %62 = vector.broadcast %48 : vector<13x1xf32> to vector<13x256xf32>
    %63 = arith.cmpf oge, %46, %62 : vector<13x256xf32>
    %c256_i32_25 = arith.constant 256 : i32
    %64 = vector.broadcast %c256_i32_25 : i32 to vector<13x256xi32>
    %65 = arith.select %63, %1, %64 : vector<13x256xi1>, vector<13x256xi32>
    %cst_26 = arith.constant dense<2147483647> : vector<13xi32>
    %66 = vector.multi_reduction <minsi>, %65, %cst_26 [1] : vector<13x256xi32> to vector<13xi32>
    %67 = vector.shape_cast %66 : vector<13xi32> to vector<13x1xi32>
    %c0_i32_27 = arith.constant 0 : i32
    %68 = vector.broadcast %c0_i32_27 : i32 to vector<13x2xi32>
    %69 = arith.cmpi eq, %2, %68 : vector<13x2xi32>
    %70 = arith.sitofp %67 : vector<13x1xi32> to vector<13x1xf32>
    %71 = vector.shape_cast %61 : vector<13x1xf32> to vector<13x1xf32>
    %72 = vector.broadcast %71 : vector<13x1xf32> to vector<13x2xf32>
    %73 = vector.shape_cast %70 : vector<13x1xf32> to vector<13x1xf32>
    %74 = vector.broadcast %73 : vector<13x1xf32> to vector<13x2xf32>
    %75 = arith.select %69, %72, %74 : vector<13x2xi1>, vector<13x2xf32>
    %c1_28 = arith.constant 1 : index
    %c0_29 = arith.constant 0 : index
    %c0_30 = arith.constant 0 : index
    %76 = vector.load %arg4[%c1_28, %c0_29, %c0_30] : memref<4x13x2xf32, #tpu.memory_space<vmem>>, vector<1x13x2xf32>
    %77 = vector.shape_cast %76 : vector<1x13x2xf32> to vector<13x2xf32>
    %78 = vector.shape_cast %75 : vector<13x2xf32> to vector<1x13x2xf32>
    tpu.vector_store %arg4[%c1_28, %c0_29, %c0_30], %78 {strides = array<i32>} : memref<4x13x2xf32, #tpu.memory_space<vmem>>, vector<1x13x2xf32>,
    %c2 = arith.constant 2 : index
    %c0_31 = arith.constant 0 : index
    %c0_32 = arith.constant 0 : index
    %79 = vector.load %arg1[%c2, %c0_31, %c0_32] : memref<4x48x256xbf16, #tpu.memory_space<vmem>>, vector<1x48x256xbf16>
    %80 = vector.shape_cast %79 : vector<1x48x256xbf16> to vector<48x256xbf16>
    %cst_33 = arith.constant dense<0.000000e+00> : vector<13x256xf32>
    %81 = tpu.matmul %0, %80, %cst_33 {dimension_numbers = #tpu.dot_dimension_numbers<[1], [0], [0], [1], [0, 0, 1, 1], [], []>} : vector<13x48xbf16>, vector<48x256xbf16>, vector<13x256xf32> -> vector<13x256xf32>
    %cst_34 = arith.constant -1.000000e+30 : f32
    %82 = vector.broadcast %cst_34 : f32 to vector<13x256xf32>
    %83 = arith.select %4, %81, %82 : vector<13x256xi1>, vector<13x256xf32>
    %cst_35 = arith.constant dense<0xFF800000> : vector<13xf32>
    %84 = vector.multi_reduction <maximumf>, %83, %cst_35 [1] : vector<13x256xf32> to vector<13xf32>
    %85 = vector.shape_cast %84 : vector<13xf32> to vector<13x1xf32>
    %86 = vector.broadcast %85 : vector<13x1xf32> to vector<13x256xf32>
    %87 = arith.subf %83, %86 : vector<13x256xf32>
    %88 = math.exp %87 : vector<13x256xf32>
    %cst_36 = arith.constant dense<0.000000e+00> : vector<13xf32>
    %89 = vector.multi_reduction <add>, %88, %cst_36 [1] : vector<13x256xf32> to vector<13xf32>
    %90 = vector.shape_cast %89 : vector<13xf32> to vector<13x1xf32>
    %91 = tpu.reciprocal %90 {approx = true} : vector<13x1xf32> -> vector<13x1xf32>
    %92 = vector.broadcast %91 : vector<13x1xf32> to vector<13x256xf32>
    %93 = arith.mulf %88, %92 : vector<13x256xf32>
    %c2_37 = arith.constant 2 : index
    %c0_38 = arith.constant 0 : index
    %c0_39 = arith.constant 0 : index
    %94 = vector.load %arg3[%c2_37, %c0_38, %c0_39] : memref<4x13x256xf32, #tpu.memory_space<vmem>>, vector<1x13x256xf32>
    %95 = vector.shape_cast %94 : vector<1x13x256xf32> to vector<13x256xf32>
    %96 = vector.shape_cast %93 : vector<13x256xf32> to vector<1x13x256xf32>
    tpu.vector_store %arg3[%c2_37, %c0_38, %c0_39], %96 {strides = array<i32>} : memref<4x13x256xf32, #tpu.memory_space<vmem>>, vector<1x13x256xf32>,
    %cst_40 = arith.constant 1.000000e+00 : f32
    %97 = vector.broadcast %cst_40 : f32 to vector<13x1xf32>
    %98 = arith.divf %97, %90 : vector<13x1xf32>
    %99 = vector.broadcast %85 : vector<13x1xf32> to vector<13x256xf32>
    %100 = arith.cmpf oge, %83, %99 : vector<13x256xf32>
    %c256_i32_41 = arith.constant 256 : i32
    %101 = vector.broadcast %c256_i32_41 : i32 to vector<13x256xi32>
    %102 = arith.select %100, %1, %101 : vector<13x256xi1>, vector<13x256xi32>
    %cst_42 = arith.constant dense<2147483647> : vector<13xi32>
    %103 = vector.multi_reduction <minsi>, %102, %cst_42 [1] : vector<13x256xi32> to vector<13xi32>
    %104 = vector.shape_cast %103 : vector<13xi32> to vector<13x1xi32>
    %c0_i32_43 = arith.constant 0 : i32
    %105 = vector.broadcast %c0_i32_43 : i32 to vector<13x2xi32>
    %106 = arith.cmpi eq, %2, %105 : vector<13x2xi32>
    %107 = arith.sitofp %104 : vector<13x1xi32> to vector<13x1xf32>
    %108 = vector.shape_cast %98 : vector<13x1xf32> to vector<13x1xf32>
    %109 = vector.broadcast %108 : vector<13x1xf32> to vector<13x2xf32>
    %110 = vector.shape_cast %107 : vector<13x1xf32> to vector<13x1xf32>
    %111 = vector.broadcast %110 : vector<13x1xf32> to vector<13x2xf32>
    %112 = arith.select %106, %109, %111 : vector<13x2xi1>, vector<13x2xf32>
    %c2_44 = arith.constant 2 : index
    %c0_45 = arith.constant 0 : index
    %c0_46 = arith.constant 0 : index
    %113 = vector.load %arg4[%c2_44, %c0_45, %c0_46] : memref<4x13x2xf32, #tpu.memory_space<vmem>>, vector<1x13x2xf32>
    %114 = vector.shape_cast %113 : vector<1x13x2xf32> to vector<13x2xf32>
    %115 = vector.shape_cast %112 : vector<13x2xf32> to vector<1x13x2xf32>
    tpu.vector_store %arg4[%c2_44, %c0_45, %c0_46], %115 {strides = array<i32>} : memref<4x13x2xf32, #tpu.memory_space<vmem>>, vector<1x13x2xf32>,
    %c3 = arith.constant 3 : index
    %c0_47 = arith.constant 0 : index
    %c0_48 = arith.constant 0 : index
    %116 = vector.load %arg1[%c3, %c0_47, %c0_48] : memref<4x48x256xbf16, #tpu.memory_space<vmem>>, vector<1x48x256xbf16>
    %117 = vector.shape_cast %116 : vector<1x48x256xbf16> to vector<48x256xbf16>
    %cst_49 = arith.constant dense<0.000000e+00> : vector<13x256xf32>
    %118 = tpu.matmul %0, %117, %cst_49 {dimension_numbers = #tpu.dot_dimension_numbers<[1], [0], [0], [1], [0, 0, 1, 1], [], []>} : vector<13x48xbf16>, vector<48x256xbf16>, vector<13x256xf32> -> vector<13x256xf32>
    %cst_50 = arith.constant -1.000000e+30 : f32
    %119 = vector.broadcast %cst_50 : f32 to vector<13x256xf32>
    %120 = arith.select %4, %118, %119 : vector<13x256xi1>, vector<13x256xf32>
    %cst_51 = arith.constant dense<0xFF800000> : vector<13xf32>
    %121 = vector.multi_reduction <maximumf>, %120, %cst_51 [1] : vector<13x256xf32> to vector<13xf32>
    %122 = vector.shape_cast %121 : vector<13xf32> to vector<13x1xf32>
    %123 = vector.broadcast %122 : vector<13x1xf32> to vector<13x256xf32>
    %124 = arith.subf %120, %123 : vector<13x256xf32>
    %125 = math.exp %124 : vector<13x256xf32>
    %cst_52 = arith.constant dense<0.000000e+00> : vector<13xf32>
    %126 = vector.multi_reduction <add>, %125, %cst_52 [1] : vector<13x256xf32> to vector<13xf32>
    %127 = vector.shape_cast %126 : vector<13xf32> to vector<13x1xf32>
    %128 = tpu.reciprocal %127 {approx = true} : vector<13x1xf32> -> vector<13x1xf32>
    %129 = vector.broadcast %128 : vector<13x1xf32> to vector<13x256xf32>
    %130 = arith.mulf %125, %129 : vector<13x256xf32>
    %c3_53 = arith.constant 3 : index
    %c0_54 = arith.constant 0 : index
    %c0_55 = arith.constant 0 : index
    %131 = vector.load %arg3[%c3_53, %c0_54, %c0_55] : memref<4x13x256xf32, #tpu.memory_space<vmem>>, vector<1x13x256xf32>
    %132 = vector.shape_cast %131 : vector<1x13x256xf32> to vector<13x256xf32>
    %133 = vector.shape_cast %130 : vector<13x256xf32> to vector<1x13x256xf32>
    tpu.vector_store %arg3[%c3_53, %c0_54, %c0_55], %133 {strides = array<i32>} : memref<4x13x256xf32, #tpu.memory_space<vmem>>, vector<1x13x256xf32>,
    %cst_56 = arith.constant 1.000000e+00 : f32
    %134 = vector.broadcast %cst_56 : f32 to vector<13x1xf32>
    %135 = arith.divf %134, %127 : vector<13x1xf32>
    %136 = vector.broadcast %122 : vector<13x1xf32> to vector<13x256xf32>
    %137 = arith.cmpf oge, %120, %136 : vector<13x256xf32>
    %c256_i32_57 = arith.constant 256 : i32
    %138 = vector.broadcast %c256_i32_57 : i32 to vector<13x256xi32>
    %139 = arith.select %137, %1, %138 : vector<13x256xi1>, vector<13x256xi32>
    %cst_58 = arith.constant dense<2147483647> : vector<13xi32>
    %140 = vector.multi_reduction <minsi>, %139, %cst_58 [1] : vector<13x256xi32> to vector<13xi32>
    %141 = vector.shape_cast %140 : vector<13xi32> to vector<13x1xi32>
    %c0_i32_59 = arith.constant 0 : i32
    %142 = vector.broadcast %c0_i32_59 : i32 to vector<13x2xi32>
    %143 = arith.cmpi eq, %2, %142 : vector<13x2xi32>
    %144 = arith.sitofp %141 : vector<13x1xi32> to vector<13x1xf32>
    %145 = vector.shape_cast %135 : vector<13x1xf32> to vector<13x1xf32>
    %146 = vector.broadcast %145 : vector<13x1xf32> to vector<13x2xf32>
    %147 = vector.shape_cast %144 : vector<13x1xf32> to vector<13x1xf32>
    %148 = vector.broadcast %147 : vector<13x1xf32> to vector<13x2xf32>
    %149 = arith.select %143, %146, %148 : vector<13x2xi1>, vector<13x2xf32>
    %c3_60 = arith.constant 3 : index
    %c0_61 = arith.constant 0 : index
    %c0_62 = arith.constant 0 : index
    %150 = vector.load %arg4[%c3_60, %c0_61, %c0_62] : memref<4x13x2xf32, #tpu.memory_space<vmem>>, vector<1x13x2xf32>
    %151 = vector.shape_cast %150 : vector<1x13x2xf32> to vector<13x2xf32>
    %152 = vector.shape_cast %149 : vector<13x2xf32> to vector<1x13x2xf32>
    tpu.vector_store %arg4[%c3_60, %c0_61, %c0_62], %152 {strides = array<i32>} : memref<4x13x2xf32, #tpu.memory_space<vmem>>, vector<1x13x2xf32>,
    return
  }
  func.func @transform_0(%arg0: i32) -> (i32, i32, i32) {
    %c0_i32 = arith.constant 0 : i32
    %c0_i32_0 = arith.constant 0 : i32
    %c0_i32_1 = arith.constant 0 : i32
    return %arg0, %c0_i32, %c0_i32_0 : i32, i32, i32
  }
  func.func @transform_1(%arg0: i32) -> (i32, i32) {
    %c0_i32 = arith.constant 0 : i32
    %c0_i32_0 = arith.constant 0 : i32
    %c0_i32_1 = arith.constant 0 : i32
    return %c0_i32, %c0_i32_0 : i32, i32
  }
  func.func @transform_2(%arg0: i32) -> (i32, i32, i32) {
    %c0_i32 = arith.constant 0 : i32
    %c0_i32_0 = arith.constant 0 : i32
    %c0_i32_1 = arith.constant 0 : i32
    return %arg0, %c0_i32, %c0_i32_0 : i32, i32, i32
  }
  func.func @transform_3(%arg0: i32) -> (i32, i32, i32) {
    %c0_i32 = arith.constant 0 : i32
    %c0_i32_0 = arith.constant 0 : i32
    %c0_i32_1 = arith.constant 0 : i32
    return %arg0, %c0_i32, %c0_i32_0 : i32, i32, i32
  }
}

</mosaic_0001>

<bundles_post_ra>
// kernel: scoremap_computer_forward.1
= control target key start
LH: loop header
LB: loop body
LE: loop exit
PB: predicated region body
PF: predicated region fallthrough
CT: control target
= control target key end

     0   :  { %s1217_s12 = smov 0   ;;  %s1680_s0 = inlined_call_operand.vmem [shape: bf16[8,48,256], index: 0, kind: input, shape index: {}]   ;;  %s1681_s1 = inlined_call_operand.vmem [shape: bf16[13,48], index: 1, kind: input, shape index: {}]   ;;  %s1682_s2 = inlined_call_operand.vmem [shape: f32[8,13,256], index: 2, kind: output, shape index: {0}]   ;;  %s1683_s3 = inlined_call_operand.vmem [shape: f32[8,13,2], index: 3, kind: output, shape index: {1}]  }
   0x1 LB: > { %s1011_s13 = sadd.s32 4294967295, %s1194_s12   ;;  %p1015_p0 = scmp.ge.s32.totalorder %s1194_s12, 1  ;;  %s1194_s12 = sphi %s1217_s12, %s14_s12  }
   0x2   : > { %p142_p1 = scmp.lt.s32.totalorder %s1194_s12, 3 }
   0x4   : > { %p143_p2 = pnand %p1015_p0, %p142_p1 }
   0x5   : > { %s1016_s14 = sshll.u32 (!%p143_p2), %s1011_s13, 2 }
   0x6   : > { %146 = sbr.rel (%p143_p2) target bundleno = 686 (0x2ae), region = 28  ;;  %p175_p3 = scmp.lt.s32.totalorder (!%p143_p2), %s1016_s14, 7 }
   0xb   : > { %v1196_v0 = vmov 0   ;;  %s1685_s14 = smov (!%p175_p3, %s1016_s14), 7  ;;  %v1121_v14 = vld [vmem:[%s1681_s1] sm:$0x7f]   ;;  %vm244_vm0 = vcmask 392192   ;;  %v198_v26 = vlaneseq  ;;  %vm298_vm2 = vcmask 1044480  }
   0xc   : > { %280 = vmatprep.mubr.bf16.mxu0 %v1196_v0  ;;  %458 = vmatprep.mubr.bf16.mxu1 %v1196_v0  ;;  %s1093_s15 = smul.u32 48, %s1685_s14  ;;  %s1091_s21 = sshll.u32 %s1685_s14, 5 }
   0xd   : > { %v1264_v27 = vand.u32 127, %v198_v26  ;;  %s1561_s24 = scalar_lea.vmem %s1682_s2, %s1091_s21  ;;  %s1092_s25 = sshll.u32 %s1685_s14, 4 }
   0xe   : > { %s1231_s18 = scalar_lea.vmem %s1680_s0, %s1093_s15  ;;  %s1631_s28 = scalar_lea.vmem %s1683_s3, %s1092_s25 }
   0xf   : > { %v1103_v1 = vld [vmem:[%s1231_s18 + $0x24] ss:$8 sps:$4 sm:$0xff]   ;;  %v1105_v2 = vld [vmem:[%s1231_s18 + $0x54] ss:$8 sps:$4 sm:$0xff]   ;;  %v1107_v3 = vld [vmem:[%s1231_s18 + $0x20] ss:$8 sps:$4 sm:$0xff]  }
  0x10   : > { %258 = vmatprep.subr.bf16.mxu0 %v1103_v1  ;;  %v1108_v4 = vld [vmem:[%s1231_s18 + $0x50] ss:$8 sps:$4 sm:$0xff]   ;;  %436 = vmatprep.subr.bf16.mxu1 %v1105_v2  ;;  %v1109_v5 = vld [vmem:[%s1231_s18 + $0x14] ss:$8 sps:$4 sm:$0xff]   ;;  %v1111_v6 = vld [vmem:[%s1231_s18 + $0x44] ss:$8 sps:$4 sm:$0xff]  }
  0x11   : > { %259 = vmatpush1.bf16.msra.mxu0 %v1107_v3  ;;  %437 = vmatpush1.bf16.msra.mxu1 %v1108_v4  ;;  %v1113_v7 = vld [vmem:[%s1231_s18 + $0x10] ss:$8 sps:$4 sm:$0xff]   ;;  %v1114_v8 = vld [vmem:[%s1231_s18 + $0x40] ss:$8 sps:$4 sm:$0xff]   ;;  %v1115_v9 = vld [vmem:[%s1231_s18 + $0x4] ss:$8 sps:$4 sm:$0xff]  }
  0x12   : > { %260 = vmatprep.subr.bf16.mxu0 %v1109_v5  ;;  %438 = vmatprep.subr.bf16.mxu1 %v1111_v6  ;;  %v1117_v10 = vld [vmem:[%s1231_s18 + $0x34] ss:$8 sps:$4 sm:$0xff]   ;;  %v1119_v11 = vld [vmem:[%s1231_s18] ss:$8 sps:$4 sm:$0xff]   ;;  %v1120_v12 = vld [vmem:[%s1231_s18 + $0x30] ss:$8 sps:$4 sm:$0xff]  }
  0x13   : > { %v1124_v13 = vld [vmem:[%s1231_s18 + $0x84] ss:$8 sps:$4 sm:$0xff]   ;;  %v1127_v15 = vld [vmem:[%s1231_s18 + $0xb4] ss:$8 sps:$4 sm:$0xff]   ;;  %v1122_v16 = vld [vmem:[%s1231_s18 + $0x80] ss:$8 sps:$4 sm:$0xff]  }
  0x14   : > { %v1125_v17 = vld [vmem:[%s1231_s18 + $0xb0] ss:$8 sps:$4 sm:$0xff]   ;;  %v1130_v18 = vld [vmem:[%s1231_s18 + $0x74] ss:$8 sps:$4 sm:$0xff]   ;;  %v1133_v19 = vld [vmem:[%s1231_s18 + $0xa4] ss:$8 sps:$4 sm:$0xff]  }
  0x15   : > { %261 = vmatpush1.bf16.msra.mxu0 %v1113_v7  ;;  %439 = vmatpush1.bf16.msra.mxu1 %v1114_v8  ;;  %v1128_v20 = vld [vmem:[%s1231_s18 + $0x70] ss:$8 sps:$4 sm:$0xff]   ;;  %v1131_v21 = vld [vmem:[%s1231_s18 + $0xa0] ss:$8 sps:$4 sm:$0xff]   ;;  %v1136_v22 = vld [vmem:[%s1231_s18 + $0x64] ss:$8 sps:$4 sm:$0xff]  }
  0x16   : > { %262 = vmatprep.subr.bf16.mxu0 %v1115_v9  ;;  %440 = vmatprep.subr.bf16.mxu1 %v1117_v10  ;;  %v1139_v23 = vld [vmem:[%s1231_s18 + $0x94] ss:$8 sps:$4 sm:$0xff]   ;;  %v1134_v24 = vld [vmem:[%s1231_s18 + $0x60] ss:$8 sps:$4 sm:$0xff]   ;;  %v1137_v25 = vld [vmem:[%s1231_s18 + $0x90] ss:$8 sps:$4 sm:$0xff]  }
  0x17   : > { %v1267_v28 = vadd.s32 128, %v1264_v27 }
  0x19   : > { %263 = vmatpush1.bf16.msra.mxu0 %v1119_v11  ;;  %441 = vmatpush1.bf16.msra.mxu1 %v1120_v12  ;;  %vm202_vm1 = vcmp.lt.s32.totalorder %v1267_v28, 192 }
  0x1a   : > { %612 = vmatprep.subr.bf16.mxu0 %v1124_v13  ;;  %788 = vmatprep.subr.bf16.mxu1 %v1127_v15 }
  0x1c   : > { %1031 = vmatmul.mubr.msk.bf16.vlgmr.msra.gmra.mxu0 %vm244_vm0, %v1121_v14  ;;  %1044 = vmatmul.mubr.msk.bf16.vlgmr.msra.gmra.mxu1 %vm244_vm0, %v1121_v14 }
  0x1d   : > { %613 = vmatpush1.bf16.msra.mxu0 %v1122_v16  ;;  %789 = vmatpush1.bf16.msra.mxu1 %v1125_v17 }
  0x1e   : > { %614 = vmatprep.subr.bf16.mxu0 %v1130_v18  ;;  %790 = vmatprep.subr.bf16.mxu1 %v1133_v19 }
  0x1f   : > { %634 = vmatprep.mubr.bf16.mxu0 %v1196_v0  ;;  %810 = vmatprep.mubr.bf16.mxu1 %v1196_v0 }
  0x21   : > { %615 = vmatpush1.bf16.msra.mxu0 %v1128_v20  ;;  %791 = vmatpush1.bf16.msra.mxu1 %v1131_v21 }
  0x22   : > { %616 = vmatprep.subr.bf16.mxu0 %v1136_v22  ;;  %792 = vmatprep.subr.bf16.mxu1 %v1139_v23 }
  0x25   : > { %617 = vmatpush1.bf16.msra.mxu0 %v1134_v24  ;;  %793 = vmatpush1.bf16.msra.mxu1 %v1137_v25 }
  0x28   : > { %1063 = vmatmul.mubr.msk.bf16.vlgmr.msra.gmra.mxu0 %vm244_vm0, %v1121_v14  ;;  %1082 = vmatmul.mubr.msk.bf16.vlgmr.msra.gmra.mxu1 %vm244_vm0, %v1121_v14 }
  0xdc   : > { %v1269_v29 = vpop.f32.mrf.mxu0  ;;  %v1271_v30 = vpop.f32.mrf.mxu1 }
  0xde   : > { %v284_v31 = vpop.f32.mrf.mxu0  ;;  %v462_v32 = vpop.f32.mrf.mxu1 }
  0xdf   : > { %v292_v33 = vsel %vm202_vm1, %v284_v31, -1e+30  ;;  %v1278_v34 = vsel %vm202_vm1, %v462_v32, -1e+30 }
  0xe0   : > { %v1280_v35 = vpop.f32.mrf.mxu0  ;;  %v1282_v36 = vpop.f32.mrf.mxu1  ;;  %v473_v37 = vmax.f32 %v1271_v30, %v1278_v34  ;;  %v295_v38 = vmax.f32 %v1269_v29, %v292_v33 }
  0xe1   : > { %v476_v43 = vsel %vm298_vm2, %v1282_v36, -inf  ;;  %v299_v45 = vsel %vm298_vm2, %v1280_v35, -inf }
  0xe2   : > { %474 = vmax.xlane.f32.xlu1 %v473_v37  ;;  %v466_v39 = vpop.f32.mrf.mxu1  ;;  %296 = vmax.xlane.f32.xlu0 %v295_v38  ;;  %v288_v40 = vpop.f32.mrf.mxu0 }
  0xe3   : > { %v1289_v41 = vsel %vm202_vm1, %v466_v39, -1e+30  ;;  %v1293_v42 = vsel %vm202_vm1, %v288_v40, -1e+30 }
  0xe4   : > { %v477_v44 = vsel %vm298_vm2, %v1289_v41, -inf  ;;  %v300_v46 = vsel %vm298_vm2, %v1293_v42, -inf }
  0xe5   : > { %v478_v47 = vmax.f32 %v476_v43, %v477_v44  ;;  %v301_v48 = vmax.f32 %v299_v45, %v300_v46 }
  0xe7   : > { %479 = vmax.xlane.f32.xlu1 %v478_v47  ;;  %302 = vmax.xlane.f32.xlu0 %v301_v48 }
  0xe8   : > { %v1303_v49 = vpop.f32.mrf.mxu0  ;;  %v1305_v50 = vpop.f32.mrf.mxu1 }
  0xea   : > { %v638_v51 = vpop.f32.mrf.mxu0  ;;  %v814_v52 = vpop.f32.mrf.mxu1 }
  0xeb   : > { %v1309_v53 = vsel %vm202_vm1, %v638_v51, -1e+30  ;;  %v1319_v57 = vsel %vm202_vm1, %v814_v52, -1e+30 }
  0xec   : > { %v1311_v54 = vpop.f32.mrf.mxu0  ;;  %v1313_v55 = vpop.f32.mrf.mxu1  ;;  %v649_v56 = vmax.f32 %v1303_v49, %v1309_v53  ;;  %v825_v62 = vmax.f32 %v1305_v50, %v1319_v57 }
  0xed   : > { %v652_v63 = vsel %vm298_vm2, %v1311_v54, -inf  ;;  %v828_v3 = vsel %vm298_vm2, %v1313_v55, -inf }
  0xee   : > { %v818_v58 = vpop.f32.mrf.mxu1  ;;  %650 = vmax.xlane.f32.xlu1 %v649_v56  ;;  %v642_v59 = vpop.f32.mrf.mxu0 }
  0xef   : > { %v1323_v60 = vsel %vm202_vm1, %v818_v58, -1e+30  ;;  %v1327_v61 = vsel %vm202_vm1, %v642_v59, -1e+30 }
  0xf0   : > { %v653_v0 = vsel %vm298_vm2, %v1327_v61, -inf  ;;  %v829_v2 = vsel %vm298_vm2, %v1323_v60, -inf }
  0xf1   : > { %v654_v1 = vmax.f32 %v652_v63, %v653_v0  ;;  %v830_v4 = vmax.f32 %v828_v3, %v829_v2 }
  0xf2   : > { %826 = vmax.xlane.f32.xlu1 %v825_v62 }
  0xf3   : > { %655 = vmax.xlane.f32.xlu0 %v654_v1 }
  0xf7   : > { %831 = vmax.xlane.f32.xlu0 %v830_v4 }
 0x16b   : > { %v475_v5 = vpop.xlane.xlu1 %474  ;;  %v297_v6 = vpop.xlane.xlu0 %296 }
 0x16c   : > { %v481_v7 = vsub.f32 %v1271_v30, %v475_v5  ;;  %v482_v8 = vsub.f32 %v1278_v34, %v475_v5  ;;  %vm516_vm3 = vcmp.ge.f32.partialorder %v1271_v30, %v475_v5  ;;  %v304_v9 = vsub.f32 %v1269_v29, %v297_v6 }
 0x16d   : > { %v305_v10 = vsub.f32 %v292_v33, %v297_v6  ;;  %vm338_vm4 = vcmp.ge.f32.partialorder %v1269_v29, %v297_v6  ;;  %vm339_vm5 = vcmp.ge.f32.partialorder %v292_v33, %v297_v6  ;;  %vm517_vm6 = vcmp.ge.f32.partialorder %v1278_v34, %v475_v5 }
 0x16e   : > { %v485_v11 = vmul.f32 1.442695, %v481_v7  ;;  %v487_v12 = vmul.f32 1.442695, %v482_v8  ;;  %v342_v13 = vsel %vm338_vm4, %v1264_v27, 256  ;;  %v343_v14 = vsel %vm339_vm5, %v1267_v28, 256 }
 0x16f   : > { %v308_v15 = vmul.f32 1.442695, %v304_v9  ;;  %vm346_vm7 = vcmp.lt.s32.totalorder %v342_v13, %v343_v14  ;;  %v310_v16 = vmul.f32 1.442695, %v305_v10  ;;  %v520_v19 = vsel %vm516_vm3, %v1264_v27, 256 }
 0x170   : > { %v480_v17 = vpop.xlane.xlu1 %479  ;;  %v303_v18 = vpop.xlane.xlu0 %302  ;;  %1140 = vpow2.f32 %v485_v11  ;;  %v1350_v22 = vsel %vm346_vm7, %v342_v13, %v343_v14  ;;  %v521_v24 = vsel %vm517_vm6, %v1267_v28, 256 }
 0x171   : > { %v483_v20 = vsub.f32 %v1282_v36, %v480_v17  ;;  %v484_v21 = vsub.f32 %v1289_v41, %v480_v17  ;;  %1142 = vpow2.f32 %v487_v12  ;;  %vm518_vm8 = vcmp.ge.f32.partialorder %v1282_v36, %v480_v17 }
 0x172   : > { %v306_v23 = vsub.f32 %v1280_v35, %v303_v18  ;;  %1144 = vpow2.f32 %v308_v15  ;;  %v307_v26 = vsub.f32 %v1293_v42, %v303_v18  ;;  %vm340_vm9 = vcmp.ge.f32.partialorder %v1280_v35, %v303_v18 }
 0x173   : > { %v489_v25 = vmul.f32 1.442695, %v483_v20  ;;  %v491_v29 = vmul.f32 1.442695, %v484_v21  ;;  %vm519_vm10 = vcmp.ge.f32.partialorder %v1289_v41, %v480_v17  ;;  %vm341_vm11 = vcmp.ge.f32.partialorder %v1293_v42, %v303_v18 }
 0x174   : > { %v349_v30 = vshra.s32 %v1350_v22, 16  ;;  %1146 = vpow2.f32 %v310_v16  ;;  %vm524_vm12 = vcmp.lt.s32.totalorder %v520_v19, %v521_v24  ;;  %v344_v31 = vsel %vm340_vm9, %v1264_v27, 256 }
 0x175   : > { %v345_v32 = vsel %vm341_vm11, %v1267_v28, 256  ;;  %v312_v33 = vmul.f32 1.442695, %v306_v23  ;;  %v1364_v37 = vsel %vm524_vm12, %v520_v19, %v521_v24  ;;  %v362_v35 = vsel %vm298_vm2, %v344_v31, 2147483647 }
 0x176   : > { %v1362_v34 = vcvt.s32.f32 %v349_v30  ;;  %1148 = vpow2.f32 %v489_v25  ;;  %v314_v38 = vmul.f32 1.442695, %v307_v26  ;;  %v527_v40 = vshra.s32 %v1364_v37, 16 }
 0x177   : > { %v651_v39 = vpop.xlane.xlu1 %650  ;;  %v363_v42 = vsel %vm298_vm2, %v345_v32, 2147483647  ;;  %1150 = vpow2.f32 %v491_v29  ;;  %v522_v45 = vsel %vm518_vm8, %v1264_v27, 256  ;;  %v523_v46 = vsel %vm519_vm10, %v1267_v28, 256 }
 0x178   : > { %352 = vmin.xlane.f32.xlu0 %v1362_v34  ;;  %v657_v43 = vsub.f32 %v1303_v49, %v651_v39  ;;  %v658_v44 = vsub.f32 %v1309_v53, %v651_v39  ;;  %vm692_vm13 = vcmp.ge.f32.partialorder %v1303_v49, %v651_v39  ;;  %vm693_vm14 = vcmp.ge.f32.partialorder %v1309_v53, %v651_v39 }
 0x179   : > { %vm364_vm15 = vcmp.lt.s32.totalorder %v362_v35, %v363_v42  ;;  %v1380_v51 = vcvt.s32.f32 %v527_v40  ;;  %1152 = vpow2.f32 %v312_v33  ;;  %v540_v58 = vsel %vm298_vm2, %v522_v45, 2147483647 }
 0x17a   : > { %v661_v47 = vmul.f32 1.442695, %v657_v43  ;;  %v663_v48 = vmul.f32 1.442695, %v658_v44  ;;  %v1382_v52 = vsel %vm364_vm15, %v362_v35, %v363_v42  ;;  %v541_v59 = vsel %vm298_vm2, %v523_v46, 2147483647 }
 0x17b   : > { %v367_v56 = vshra.s32 %v1382_v52, 16  ;;  %v827_v36 = vpop.xlane.xlu1 %826  ;;  %v696_v0 = vsel %vm692_vm13, %v1264_v27, 256  ;;  %v697_v1 = vsel %vm693_vm14, %v1267_v28, 256  ;;  %1154 = vpow2.f32 %v314_v38 }
 0x17c   : > { %530 = vmin.xlane.f32.xlu0 %v1380_v51  ;;  %v833_v62 = vsub.f32 %v1305_v50, %v827_v36  ;;  %v834_v41 = vsub.f32 %v1319_v57, %v827_v36  ;;  %v656_v63 = vpop.xlane.xlu0 %655  ;;  %1156 = vpow2.f32 %v661_v47  ;;  %vm868_vm0 = vcmp.ge.f32.partialorder %v1305_v50, %v827_v36 }
 0x17d   : > { %v1396_v2 = vcvt.s32.f32 %v367_v56  ;;  %v659_v3 = vsub.f32 %v1311_v54, %v656_v63  ;;  %v1399_v4 = vpop.eup %1140  ;;  %v660_v6 = vsub.f32 %v1327_v61, %v656_v63  ;;  %1158 = vpow2.f32 %v663_v48 }
 0x17e   : > { %v837_v5 = vmul.f32 1.442695, %v833_v62  ;;  %v1402_v7 = vpop.eup %1142  ;;  %vm542_vm1 = vcmp.lt.s32.totalorder %v540_v58, %v541_v59  ;;  %vm700_vm3 = vcmp.lt.s32.totalorder %v696_v0, %v697_v1  ;;  %v839_v53 = vmul.f32 1.442695, %v834_v41 }
 0x17f   : > { %370 = vmin.xlane.f32.xlu1 %v1396_v2  ;;  %v1406_v49 = vpop.eup %1144  ;;  %vm869_vm4 = vcmp.ge.f32.partialorder %v1319_v57, %v827_v36  ;;  %v1409_v8 = vsel %vm542_vm1, %v540_v58, %v541_v59  ;;  %v1411_v9 = vsel %vm700_vm3, %v696_v0, %v697_v1  ;;  %v665_v11 = vmul.f32 1.442695, %v659_v3 }
 0x180   : > { %v832_v10 = vpop.xlane.xlu0 %831  ;;  %vm694_vm5 = vcmp.ge.f32.partialorder %v1311_v54, %v656_v63  ;;  %v545_v12 = vshra.s32 %v1409_v8, 16  ;;  %v703_v13 = vshra.s32 %v1411_v9, 16  ;;  %1160 = vpow2.f32 %v837_v5 }
 0x181   : > { %v1416_v14 = vpop.eup %1146  ;;  %v667_v15 = vmul.f32 1.442695, %v660_v6  ;;  %vm695_vm6 = vcmp.ge.f32.partialorder %v1327_v61, %v656_v63  ;;  %v835_v16 = vsub.f32 %v1313_v55, %v832_v10  ;;  %v836_v19 = vsub.f32 %v1323_v60, %v832_v10 }
 0x182   : > { %v1420_v17 = vcvt.s32.f32 %v545_v12  ;;  %v1422_v18 = vcvt.s32.f32 %v703_v13  ;;  %vm870_vm7 = vcmp.ge.f32.partialorder %v1313_v55, %v832_v10  ;;  %vm871_vm8 = vcmp.ge.f32.partialorder %v1323_v60, %v832_v10 }
 0x183   : > { %v1426_v20 = vpop.eup %1148  ;;  %v872_v21 = vsel %vm868_vm0, %v1264_v27, 256  ;;  %v873_v23 = vsel %vm869_vm4, %v1267_v28, 256  ;;  %v698_v24 = vsel %vm694_vm5, %v1264_v27, 256  ;;  %1162 = vpow2.f32 %v665_v11 }
 0x184   : > { %v1438_v25 = vpop.eup %1150  ;;  %548 = vmin.xlane.f32.xlu1 %v1420_v17  ;;  %706 = vmin.xlane.f32.xlu0 %v1422_v18  ;;  %vm876_vm9 = vcmp.lt.s32.totalorder %v872_v21, %v873_v23  ;;  %v699_v50 = vsel %vm695_vm6, %v1267_v28, 256  ;;  %v716_v26 = vsel %vm298_vm2, %v698_v24, 2147483647  ;;  %1164 = vpow2.f32 %v667_v15 }
 0x185   : > { %v841_v57 = vmul.f32 1.442695, %v835_v16  ;;  %v1446_v29 = vsel %vm876_vm9, %v872_v21, %v873_v23  ;;  %v717_v54 = vsel %vm298_vm2, %v699_v50, 2147483647  ;;  %v874_v31 = vsel %vm870_vm7, %v1264_v27, 256 }
 0x186   : > { %v879_v30 = vshra.s32 %v1446_v29, 16  ;;  %vm718_vm10 = vcmp.lt.s32.totalorder %v716_v26, %v717_v54  ;;  %v875_v61 = vsel %vm871_vm8, %v1267_v28, 256  ;;  %v1456_v32 = vpop.eup %1152  ;;  %v843_v33 = vmul.f32 1.442695, %v836_v19 }
 0x187   : > { %v1458_v35 = vsel %vm718_vm10, %v716_v26, %v717_v54  ;;  %v892_v38 = vsel %vm298_vm2, %v874_v31, 2147483647  ;;  %v893_v39 = vsel %vm298_vm2, %v875_v61, 2147483647  ;;  %1166 = vpow2.f32 %v839_v53 }
 0x188   : > { %v1462_v40 = vcvt.s32.f32 %v879_v30  ;;  %v721_v42 = vshra.s32 %v1458_v35, 16  ;;  %vm894_vm11 = vcmp.lt.s32.totalorder %v892_v38, %v893_v39  ;;  %v1465_v55 = vpop.eup %1154  ;;  %1168 = vpow2.f32 %v841_v57 }
 0x189   : > { %v1467_v43 = vsel %vm894_vm11, %v892_v38, %v893_v39  ;;  %v1469_v28 = vpop.eup %1156  ;;  %1170 = vpow2.f32 %v843_v33  ;;  %v316_v46 = vadd.f32 %v1416_v14, %v1406_v49  ;;  %v319_v56 = vsel %vm298_vm2, %v1456_v32, 0.0 }
 0x18a   : > { %882 = vmin.xlane.f32.xlu0 %v1462_v40  ;;  %v1472_v60 = vcvt.s32.f32 %v721_v42  ;;  %v897_v44 = vshra.s32 %v1467_v43, 16  ;;  %v1475_v45 = vpop.eup %1158  ;;  %v320_v36 = vsel %vm298_vm2, %v1465_v55, 0.0  ;;  %v493_v58 = vadd.f32 %v1402_v7, %v1399_v4 }
 0x18b   : > { %v321_v41 = vadd.f32 %v320_v36, %v319_v56  ;;  %v496_v63 = vsel %vm298_vm2, %v1426_v20, 0.0  ;;  %v497_v0 = vsel %vm298_vm2, %v1438_v25, 0.0  ;;  %v669_v1 = vadd.f32 %v1475_v45, %v1469_v28 }
 0x18c   : > { %724 = vmin.xlane.f32.xlu1 %v1472_v60  ;;  %v1480_v47 = vcvt.s32.f32 %v897_v44  ;;  %v498_v5 = vadd.f32 %v497_v0, %v496_v63  ;;  %v348_v21 = vand.u32 65535, %v1350_v22  ;;  %v526_v50 = vand.u32 65535, %v1364_v37 }
 0x18d   : > { %v1482_v48 = vpop.eup %1160  ;;  %v366_v57 = vand.u32 65535, %v1382_v52  ;;  %v702_v33 = vand.u32 65535, %v1411_v9  ;;  %v878_v44 = vand.u32 65535, %v1446_v29  ;;  %vm380_vm4 = vcmp.eq.s32.totalorder %v1264_v27, 0 }
 0x18e   : > { %317 = vadd.xlane.f32.xlu0 %v316_v46  ;;  %v350_v24 = vcvt.s32.f32 %v348_v21  ;;  %v528_v30 = vcvt.s32.f32 %v526_v50  ;;  %vm385_vm5 = vcmask 15360   ;;  %vm387_vm6 = vcmask 12288  }
 0x18f   : > { %v368_v61 = vcvt.s32.f32 %v366_v57  ;;  %v880_v46 = vcvt.s32.f32 %v878_v44 }
 0x190   : > { %900 = vmin.xlane.f32.xlu1 %v1480_v47  ;;  %v1491_v59 = vpop.eup %1162 }
 0x191   : > { %v1493_v62 = vpop.eup %1164  ;;  %v672_v53 = vsel %vm298_vm2, %v1491_v59, 0.0 }
 0x192   : > { %494 = vadd.xlane.f32.xlu0 %v493_v58  ;;  %v673_v10 = vsel %vm298_vm2, %v1493_v62, 0.0 }
 0x193   : > { %v674_v13 = vadd.f32 %v673_v10, %v672_v53 }
 0x194   : > { %322 = vadd.xlane.f32.xlu1 %v321_v41  ;;  %v1501_v3 = vpop.eup %1166 }
 0x195   : > { %v1503_v6 = vpop.eup %1168  ;;  %v845_v12 = vadd.f32 %v1501_v3, %v1482_v48 }
 0x196   : > { %670 = vadd.xlane.f32.xlu0 %v669_v1  ;;  %v1509_v11 = vpop.eup %1170  ;;  %v848_v15 = vsel %vm298_vm2, %v1503_v6, 0.0 }
 0x197   : > { %v849_v16 = vsel %vm298_vm2, %v1509_v11, 0.0 }
 0x198   : > { %499 = vadd.xlane.f32.xlu1 %v498_v5  ;;  %v850_v19 = vadd.f32 %v849_v16, %v848_v15 }
 0x19a   : > { %846 = vadd.xlane.f32.xlu0 %v845_v12 }
 0x19c   : > { %675 = vadd.xlane.f32.xlu1 %v674_v13 }
 0x1a0   : > { %851 = vadd.xlane.f32.xlu1 %v850_v19 }
 0x201   : > { %v1518_v23 = vpop.xlane.xlu0 %352 }
 0x202   : > { %vm354_vm12 = vcmp.eq.f32.partialorder %v1362_v34, %v1518_v23  ;;  %v544_v34 = vand.u32 65535, %v1409_v8  ;;  %v720_v8 = vand.u32 65535, %v1458_v35 }
 0x203   : > { %v355_v26 = vsel %vm354_vm12, %v350_v24, inf }
 0x204   : > { %356 = vmin.xlane.f32.xlu0 %v355_v26  ;;  %v546_v39 = vcvt.s32.f32 %v544_v34  ;;  %v722_v36 = vcvt.s32.f32 %v720_v8 }
 0x205   : > { %v1524_v54 = vpop.xlane.xlu0 %530 }
 0x206   : > { %vm532_vm2 = vcmp.eq.f32.partialorder %v1380_v51, %v1524_v54  ;;  %v704_v51 = vcvt.s32.f32 %v702_v33 }
 0x207   : > { %v533_v31 = vsel %vm532_vm2, %v528_v30, inf  ;;  %v359_v30 = vcvt.f32.s32 %v1518_v23 }
 0x208   : > { %v1528_v22 = vpop.xlane.xlu1 %370  ;;  %534 = vmin.xlane.f32.xlu0 %v533_v31 }
 0x209   : > { %vm372_vm13 = vcmp.eq.f32.partialorder %v1396_v2, %v1528_v22  ;;  %v377_v34 = vcvt.f32.s32 %v1528_v22 }
 0x20a   : > { %v373_v37 = vsel %vm372_vm13, %v368_v61, inf  ;;  %v360_v61 = vshll.u32 %v359_v30, 16 }
 0x20b   : > { %374 = vmin.xlane.f32.xlu1 %v373_v37  ;;  %v378_v22 = vshll.u32 %v377_v34, 16 }
 0x20d   : > { %v1534_v52 = vpop.xlane.xlu1 %548  ;;  %v1536_v38 = vpop.xlane.xlu0 %706 }
 0x20e   : > { %vm550_vm14 = vcmp.eq.f32.partialorder %v1420_v17, %v1534_v52  ;;  %vm708_vm15 = vcmp.eq.f32.partialorder %v1422_v18, %v1536_v38  ;;  %v896_v18 = vand.u32 65535, %v1467_v43  ;;  %v713_v8 = vcvt.f32.s32 %v1536_v38 }
 0x20f   : > { %v551_v42 = vsel %vm550_vm14, %v546_v39, inf  ;;  %v709_v2 = vsel %vm708_vm15, %v704_v51, inf }
 0x210   : > { %552 = vmin.xlane.f32.xlu1 %v551_v42  ;;  %710 = vmin.xlane.f32.xlu0 %v709_v2  ;;  %v898_v41 = vcvt.s32.f32 %v896_v18  ;;  %v555_v2 = vcvt.f32.s32 %v1534_v52 }
 0x212   : > { %v556_v18 = vshll.u32 %v555_v2, 16 }
 0x213   : > { %v1544_v9 = vpop.xlane.xlu0 %882 }
 0x214   : > { %vm884_vm0 = vcmp.eq.f32.partialorder %v1462_v40, %v1544_v9 }
 0x215   : > { %v1548_v56 = vpop.xlane.xlu1 %724  ;;  %v885_v17 = vsel %vm884_vm0, %v880_v46, inf }
 0x216   : > { %886 = vmin.xlane.f32.xlu0 %v885_v17  ;;  %vm726_vm1 = vcmp.eq.f32.partialorder %v1472_v60, %v1548_v56 }
 0x217   : > { %v318_v29 = vpop.xlane.xlu0 %317  ;;  %v727_v58 = vsel %vm726_vm1, %v722_v36, inf }
 0x218   : > { %1172 = vrcp.f32 %v318_v29  ;;  %728 = vmin.xlane.f32.xlu1 %v727_v58 }
 0x219   : > { %v1553_v35 = vpop.xlane.xlu1 %900 }
 0x21a   : > { %vm902_vm3 = vcmp.eq.f32.partialorder %v1480_v47, %v1553_v35 }
 0x21b   : > { %v495_v40 = vpop.xlane.xlu0 %494  ;;  %v903_v63 = vsel %vm902_vm3, %v898_v41, inf  ;;  %v714_v41 = vshll.u32 %v713_v8, 16 }
 0x21c   : > { %1174 = vrcp.f32 %v495_v40  ;;  %904 = vmin.xlane.f32.xlu1 %v903_v63  ;;  %v889_v63 = vcvt.f32.s32 %v1544_v9 }
 0x21d   : > { %v323_v43 = vpop.xlane.xlu1 %322 }
 0x21e   : > { %1176 = vrcp.f32 %v323_v43 }
 0x21f   : > { %v671_v0 = vpop.xlane.xlu0 %670 }
 0x220   : > { %1178 = vrcp.f32 %v671_v0 }
 0x221   : > { %v500_v60 = vpop.xlane.xlu1 %499 }
 0x222   : > { %1180 = vrcp.f32 %v500_v60  ;;  %v731_v60 = vcvt.f32.s32 %v1548_v56 }
 0x223   : > { %v847_v1 = vpop.xlane.xlu0 %846 }
 0x224   : > { %1182 = vrcp.f32 %v847_v1  ;;  %v732_v56 = vshll.u32 %v731_v60, 16 }
 0x225   : > { %v1173_v5 = vpop.eup %1172  ;;  %v676_v47 = vpop.xlane.xlu1 %675 }
 0x226   : > { %v326_v53 = vmul.f32 %v1173_v5, %v1406_v49  ;;  %v327_v10 = vmul.f32 %v1173_v5, %v1416_v14  ;;  %1184 = vrcp.f32 %v676_v47 }
 0x228   : > { %330 = vst [vmem:[%s1561_s24] sm:$0xff] %v326_v53  ;;  %331 = vst [vmem:[%s1561_s24 + $0x8] sm:$0xff] %v327_v10  ;;  %v890_v53 = vshll.u32 %v889_v63, 16 }
 0x229   : > { %v1567_v12 = vpop.eup %1174  ;;  %v852_v13 = vpop.xlane.xlu1 %851 }
 0x22a   : > { %v503_v15 = vmul.f32 %v1567_v12, %v1399_v4  ;;  %v504_v16 = vmul.f32 %v1567_v12, %v1402_v7  ;;  %1186 = vrcp.f32 %v852_v13 }
 0x22b   : > { %v1573_v49 = vpop.eup %1176 }
 0x22c   : > { %1045 = vst [vmem:[%s1561_s24 + $0x20] sm:$0xff] %v503_v15  ;;  %1046 = vst [vmem:[%s1561_s24 + $0x28] sm:$0xff] %v504_v16  ;;  %v328_v14 = vmul.f32 %v1573_v49, %v1456_v32  ;;  %v329_v19 = vmul.f32 %v1573_v49, %v1465_v55  ;;  %v907_v15 = vcvt.f32.s32 %v1553_v35 }
 0x22d   : > { %v1581_v21 = vpop.eup %1178 }
 0x22e   : > { %332 = vst [vmem:[%s1561_s24 + $0x10] sm:$0x1f] %v328_v14  ;;  %333 = vst [vmem:[%s1561_s24 + $0x18] sm:$0x1f] %v329_v19  ;;  %v679_v4 = vmul.f32 %v1581_v21, %v1469_v28  ;;  %v680_v7 = vmul.f32 %v1581_v21, %v1475_v45 }
 0x22f   : > { %v1589_v24 = vpop.eup %1180 }
 0x230   : > { %1064 = vst [vmem:[%s1561_s24 + $0x40] sm:$0xff] %v679_v4  ;;  %1065 = vst [vmem:[%s1561_s24 + $0x48] sm:$0xff] %v680_v7  ;;  %v505_v32 = vmul.f32 %v1589_v24, %v1426_v20  ;;  %v506_v55 = vmul.f32 %v1589_v24, %v1438_v25  ;;  %v908_v7 = vshll.u32 %v907_v15, 16 }
 0x231   : > { %v1597_v50 = vpop.eup %1182 }
 0x232   : > { %1047 = vst [vmem:[%s1561_s24 + $0x30] sm:$0x1f] %v505_v32  ;;  %1048 = vst [vmem:[%s1561_s24 + $0x38] sm:$0x1f] %v506_v55  ;;  %v855_v28 = vmul.f32 %v1597_v50, %v1482_v48  ;;  %v856_v45 = vmul.f32 %v1597_v50, %v1501_v3 }
 0x233   : > { %v1605_v26 = vpop.eup %1184 }
 0x234   : > { %1083 = vst [vmem:[%s1561_s24 + $0x60] sm:$0xff] %v855_v28  ;;  %1084 = vst [vmem:[%s1561_s24 + $0x68] sm:$0xff] %v856_v45  ;;  %v681_v20 = vmul.f32 %v1605_v26, %v1491_v59  ;;  %v682_v25 = vmul.f32 %v1605_v26, %v1493_v62  ;;  %v537_v59 = vcvt.f32.s32 %v1524_v54 }
 0x236   : > { %1066 = vst [vmem:[%s1561_s24 + $0x50] sm:$0x1f] %v681_v20  ;;  %1067 = vst [vmem:[%s1561_s24 + $0x58] sm:$0x1f] %v682_v25 }
 0x237   : > { %v1615_v57 = vpop.eup %1186 }
 0x238   : > { %v857_v48 = vmul.f32 %v1615_v57, %v1503_v6  ;;  %v858_v3 = vmul.f32 %v1615_v57, %v1509_v11  ;;  %v538_v6 = vshll.u32 %v537_v59, 16 }
 0x23a   : > { %1085 = vst [vmem:[%s1561_s24 + $0x70] sm:$0x1f] %v857_v48  ;;  %1086 = vst [vmem:[%s1561_s24 + $0x78] sm:$0x1f] %v858_v3 }
 0x28d   : > { %v357_v31 = vpop.xlane.xlu0 %356 }
 0x28e   : > { %v358_v37 = vcvt.f32.s32 %v357_v31 }
 0x290   : > { %v361_v62 = vadd.s32 %v360_v61, %v358_v37 }
 0x291   : > { %v535_v33 = vpop.xlane.xlu0 %534 }
 0x292   : > { %v381_v11 = vcvt.s32.f32 %v361_v62  ;;  %v536_v23 = vcvt.f32.s32 %v535_v33 }
 0x294   : > { %v383_v54 = vsel %vm380_vm4, %v1173_v5, %v381_v11  ;;  %v539_v39 = vadd.s32 %v538_v6, %v536_v23  ;;  %v375_v51 = vpop.xlane.xlu1 %374 }
 0x295   : > { %386 = vst.msk [vmem:[%s1631_s28] sm:$0xff] %vm385_vm5, %v383_v54  ;;  %v376_v42 = vcvt.f32.s32 %v375_v51 }
 0x296   : > { %v558_v44 = vcvt.s32.f32 %v539_v39 }
 0x297   : > { %v379_v46 = vadd.s32 %v378_v22, %v376_v42 }
 0x298   : > { %v560_v17 = vsel %vm380_vm4, %v1567_v12, %v558_v44 }
 0x299   : > { %1049 = vst.msk [vmem:[%s1631_s28 + $0x10] sm:$0xff] %vm385_vm5, %v560_v17  ;;  %v382_v36 = vcvt.s32.f32 %v379_v46  ;;  %v553_v29 = vpop.xlane.xlu1 %552  ;;  %v711_v58 = vpop.xlane.xlu0 %710 }
 0x29a   : > { %v554_v38 = vcvt.f32.s32 %v553_v29  ;;  %v712_v40 = vcvt.f32.s32 %v711_v58 }
 0x29b   : > { %v384_v52 = vsel %vm380_vm4, %v1573_v49, %v382_v36 }
 0x29c   : > { %388 = vst.msk [vmem:[%s1631_s28 + $0x8] sm:$0x1f] %vm387_vm6, %v384_v52  ;;  %v557_v43 = vadd.s32 %v556_v18, %v554_v38  ;;  %v715_v0 = vadd.s32 %v714_v41, %v712_v40 }
 0x29e   : > { %v559_v1 = vcvt.s32.f32 %v557_v43  ;;  %v734_v5 = vcvt.s32.f32 %v715_v0 }
 0x29f   : > { %v887_v47 = vpop.xlane.xlu0 %886 }
 0x2a0   : > { %v561_v10 = vsel %vm380_vm4, %v1589_v24, %v559_v1  ;;  %v736_v12 = vsel %vm380_vm4, %v1581_v21, %v734_v5  ;;  %v888_v13 = vcvt.f32.s32 %v887_v47 }
 0x2a1   : > { %1050 = vst.msk [vmem:[%s1631_s28 + $0x18] sm:$0x1f] %vm387_vm6, %v561_v10  ;;  %v729_v9 = vpop.xlane.xlu1 %728 }
 0x2a2   : > { %1068 = vst.msk [vmem:[%s1631_s28 + $0x20] sm:$0xff] %vm385_vm5, %v736_v12  ;;  %v891_v16 = vadd.s32 %v890_v53, %v888_v13  ;;  %v730_v49 = vcvt.f32.s32 %v729_v9 }
 0x2a4   : > { %v910_v14 = vcvt.s32.f32 %v891_v16  ;;  %v733_v19 = vadd.s32 %v732_v56, %v730_v49 }
 0x2a5   : > { %v905_v4 = vpop.xlane.xlu1 %904 }
 0x2a6   : > { %v912_v21 = vsel %vm380_vm4, %v1597_v50, %v910_v14  ;;  %v735_v24 = vcvt.s32.f32 %v733_v19  ;;  %v906_v32 = vcvt.f32.s32 %v905_v4 }
 0x2a7   : > { %1087 = vst.msk [vmem:[%s1631_s28 + $0x30] sm:$0xff] %vm385_vm5, %v912_v21 }
 0x2a8   : > { %v737_v55 = vsel %vm380_vm4, %v1605_v26, %v735_v24  ;;  %v909_v35 = vadd.s32 %v908_v7, %v906_v32 }
 0x2a9   : > { %1069 = vst.msk [vmem:[%s1631_s28 + $0x28] sm:$0x1f] %vm387_vm6, %v737_v55 }
 0x2aa   : > { %v911_v28 = vcvt.s32.f32 %v909_v35 }
 0x2ac   : > { %v913_v45 = vsel %vm380_vm4, %v1615_v57, %v911_v28 }
 0x2ad   : > { %1088 = vst.msk [vmem:[%s1631_s28 + $0x38] sm:$0x1f] %vm387_vm6, %v913_v45 }
 0x2ae PF: > { %s14_s12 = sadd.s32 1, %s1194_s12  }
 0x2af   : > { %p11_p4 = scmp.ge.s32.totalorder %s14_s12, 4  }
 0x2b1   :  { %13 = sbr.rel (!%p11_p4) target bundleno = 1 (0x1), region = 79 }

// kernel: sub.4
= control target key start
LH: loop header
LB: loop body
LE: loop exit
PB: predicated region body
PF: predicated region fallthrough
CT: control target
= control target key end

     0   :  { %s34_s0 = inlined_call_operand.vmem [shape: s32[8,13,1], index: 0, kind: input, shape index: {}]   ;;  %s35_s1 = inlined_call_operand.vmem [shape: s32[8,13,1], index: 1, kind: input, shape index: {}]   ;;  %s36_s2 = inlined_call_operand.vmem [shape: s32[8,13,1], index: 2, kind: output, shape index: {}]  }
   0x1   :  { %v3_v0 = vld [vmem:[%s34_s0] sm:$0xff] }
   0x2   :  { %v4_v1 = vld [vmem:[%s35_s1] sm:$0xff] }
   0x3   :  { %v7_v2 = vsub.s32 %v3_v0, %v4_v1 }
   0x5   :  { %9 = vst [vmem:[%s36_s2] sm:$0xff] %v7_v2 }

</bundles_post_ra>
